<compile_context>
chip_gen: v7x
topology: tpu7x:2x2x1
jax: 0.10.0
libtpu: 0.0.40
codegen_flags: <defaults>
</compile_context>

<pallas_src>
import functools

import jax
import jax.numpy as jnp
from jax.experimental import pallas as pl
from jax.experimental.pallas import tpu as pltpu


def _round_up(x, m):
    return ((x + m - 1) // m) * m


def _pad_to(a, shape):
    return jnp.pad(a, [(0, t - s) for s, t in zip(a.shape, shape)])


def base_gnn_kernel(x_ref, w1_ref, b1_ref, w2_ref, b2_ref, w3_ref, b3_ref,
                    h_ref, out_ref, acc_ref, *, n_nodes, tn):
    """Fused mean-readout + feat_lin + (Linear -> ReLU -> Linear) head.

    x_ref  : [TB, TN, F]  bf16 node-feature tile (streamed)
    w1/b1  : [F, Hp], [1, Hp]     feat_lin          (zero-padded to Hp lanes)
    w2/b2  : [Hp, Hp], [1, Hp]    out_lin[0]
    w3/b3  : [Hp, H2p], [1, H2p]  out_lin[2]
    h_ref  : [TB, Hp]   graph embedding (valid lanes = H)
    out_ref: [TB, H2p]  projection head (valid lanes = H//2)
    acc_ref: [TB, F]    f32 node-sum accumulator (VMEM scratch)
    """
    k = pl.program_id(1)
    last = pl.num_programs(1) - 1

    @pl.when(k == 0)
    def _init():
        acc_ref[...] = jnp.zeros_like(acc_ref)

    # Stream x as bf16, but accumulate the node-sum in f32 (v5e VPU has no
    # bf16 path; f32 accumulation is also more accurate).  The reduction over
    # the node (sublane) axis goes to the XLU, leaving VALU slots free.
    x = x_ref[...].astype(jnp.float32)                            # [TB, TN, F]

    rem = n_nodes % tn
    if rem == 0:
        # Evenly tiled: no masking work at all.
        acc_ref[...] += jnp.sum(x, axis=1)                        # [TB, F]
    else:
        # Only the final node tile is partial; mask just there.
        @pl.when(k != last)
        def _full_tile():
            acc_ref[...] += jnp.sum(x, axis=1)

        @pl.when(k == last)
        def _partial_tile():
            node_idx = jax.lax.broadcasted_iota(jnp.int32, x.shape, 1)
            xm = jnp.where(node_idx < rem, x, 0.0)
            acc_ref[...] += jnp.sum(xm, axis=1)

    @pl.when(k == last)
    def _epilogue():
        inv_n = 1.0 / float(n_nodes)                              # static scalar
        pooled = acc_ref[...] * inv_n                             # mean readout
        h = jnp.dot(pooled, w1_ref[...],
                    preferred_element_type=jnp.float32) + b1_ref[...]
        z = jnp.dot(h, w2_ref[...],
                    preferred_element_type=jnp.float32) + b2_ref[...]
        z = jnp.maximum(z, 0.0)
        out = jnp.dot(z, w3_ref[...],
                      preferred_element_type=jnp.float32) + b3_ref[...]
        h_ref[...] = h.astype(h_ref.dtype)
        out_ref[...] = out.astype(out_ref.dtype)


def base_gnn_forward(x, params, *, tb=None, tn=None):
    """x: [B, N, F] float node features. Returns (h [B,H], out [B,H//2])."""
    B, N, F = x.shape
    H = params["w1"].shape[1]
    H2 = params["w3"].shape[1]

    # Lane-dense output widths: zero-pad the tiny MLP head to 128-lane
    # multiples (padded columns/rows are zero, so valid lanes are unchanged).
    Hp = _round_up(H, 128)
    H2p = _round_up(H2, 128)
    w1 = _pad_to(params["w1"], (F, Hp))
    b1 = _pad_to(params["b1"], (1, Hp))
    w2 = _pad_to(params["w2"], (Hp, Hp))
    b2 = _pad_to(params["b2"], (1, Hp))
    w3 = _pad_to(params["w3"], (Hp, H2p))
    b3 = _pad_to(params["b3"], (1, H2p))

    # x dominates HBM traffic: stream it in bf16 (accumulation stays f32).
    x_bf16 = x.astype(jnp.bfloat16)

    # Tile sizing: batch tile is a multiple of 8 sublanes (grows toward MXU
    # row width for large B); node tile sized so the double-buffered bf16 x
    # tile is ~4 MiB per buffer — big enough to amortize per-step pipeline
    # overhead, comfortably inside v7x's 64 MiB VMEM, headroom on v5e/v6e.
    if tb is None:
        tb = min(512, _round_up(B, 8))
    if tn is None:
        budget = 4 * 1024 * 1024                    # bytes per x buffer
        rows = max(8, (budget // max(1, tb * F * 2)) // 8 * 8)
        tn = min(_round_up(N, 8), rows)

    grid = (pl.cdiv(B, tb), pl.cdiv(N, tn))
    kernel = functools.partial(base_gnn_kernel, n_nodes=N, tn=tn)

    h_full, out_full = pl.pallas_call(
        kernel,
        out_shape=(
            jax.ShapeDtypeStruct((B, Hp), jnp.float32),
            jax.ShapeDtypeStruct((B, H2p), jnp.float32),
        ),
        grid_spec=pltpu.PrefetchScalarGridSpec(
            num_scalar_prefetch=0,
            grid=grid,
            in_specs=[
                pl.BlockSpec((tb, tn, F), lambda b, k: (b, k, 0)),  # x (streamed)
                pl.BlockSpec((F, Hp), lambda b, k: (0, 0)),         # w1 (resident)
                pl.BlockSpec((1, Hp), lambda b, k: (0, 0)),         # b1
                pl.BlockSpec((Hp, Hp), lambda b, k: (0, 0)),        # w2
                pl.BlockSpec((1, Hp), lambda b, k: (0, 0)),         # b2
                pl.BlockSpec((Hp, H2p), lambda b, k: (0, 0)),       # w3
                pl.BlockSpec((1, H2p), lambda b, k: (0, 0)),        # b3
            ],
            out_specs=(
                pl.BlockSpec((tb, Hp), lambda b, k: (b, 0)),
                pl.BlockSpec((tb, H2p), lambda b, k: (b, 0)),
            ),
            scratch_shapes=[pltpu.VMEM((tb, F), jnp.float32)],
        ),
        compiler_params=pltpu.CompilerParams(
            dimension_semantics=("parallel", "arbitrary"),
            vmem_limit_bytes=32 * 1024 * 1024,
        ),
    )(x_bf16, w1, b1, w2, b2, w3, b3)

    # Strip the lane padding back off.
    return h_full[:, :H], out_full[:, :H2]


def init_params(key, gnn_out_feats, ffn_hidden_feats):
    """Deterministic init mimicking torch.nn.Linear (uniform +/- 1/sqrt(fan_in)).

    Weights stored as [in, out]; biases as [1, out].
    """
    H = ffn_hidden_feats
    H2 = ffn_hidden_feats // 2
    keys = jax.random.split(key, 6)

    def lin(kw, kb, fan_in, fan_out):
        bound = 1.0 / jnp.sqrt(float(fan_in))
        w = jax.random.uniform(kw, (fan_in, fan_out), jnp.float32, -bound, bound)
        b = jax.random.uniform(kb, (1, fan_out), jnp.float32, -bound, bound)
        return w, b

    w1, b1 = lin(keys[0], keys[1], gnn_out_feats, H)
    w2, b2 = lin(keys[2], keys[3], H, H)
    w3, b3 = lin(keys[4], keys[5], H, H2)
    return {"w1": w1, "b1": b1, "w2": w2, "b2": b2, "w3": w3, "b3": b3}


def reference_forward(x, params):
    pooled = jnp.mean(x, axis=1)
    h = pooled @ params["w1"] + params["b1"]
    z = jnp.maximum(h @ params["w2"] + params["b2"], 0.0)
    out = z @ params["w3"] + params["b3"]
    return h, out


if __name__ == "__main__":
    gnn_out_feats = 32
    ffn_hidden_feats = 32

    key = jax.random.PRNGKey(0)
    k_x, k_p, k_x2 = jax.random.split(key, 3)
    params = init_params(k_p, gnn_out_feats, ffn_hidden_feats)

    # Tolerances are loose because the kernel streams x in bf16 and matmul
    # precision may differ between Mosaic and the XLA reference path.
    ATOL = RTOL = 2e-2

    # Case 1: small, evenly tiled shapes (8 graphs x 16 nodes) — exercises the
    # unmasked fast path.
    B, N = 8, 16
    x = jax.random.normal(k_x, (B, N, gnn_out_feats), dtype=jnp.float32)
    h, out = base_gnn_forward(x, params)
    jax.block_until_ready((h, out))
    x_q = x.astype(jnp.bfloat16).astype(jnp.float32)   # mirror bf16 streaming
    h_ref, out_ref = reference_forward(x_q, params)
    assert h.shape == (B, ffn_hidden_feats)
    assert out.shape == (B, ffn_hidden_feats // 2)
    assert jnp.allclose(h, h_ref, atol=ATOL, rtol=RTOL)
    assert jnp.allclose(out, out_ref, atol=ATOL, rtol=RTOL)

    # Case 2: multi-block grid with partial edge tiles (10 graphs x 20 nodes,
    # tb=8, tn=8 -> grid (2, 3)) to exercise accumulation + last-tile masking.
    B2, N2 = 10, 20
    x2 = jax.random.normal(k_x2, (B2, N2, gnn_out_feats), dtype=jnp.float32)
    h2, out2 = base_gnn_forward(x2, params, tb=8, tn=8)
    jax.block_until_ready((h2, out2))
    x2_q = x2.astype(jnp.bfloat16).astype(jnp.float32)
    h2_ref, out2_ref = reference_forward(x2_q, params)
    assert h2.shape == (B2, ffn_hidden_feats)
    assert out2.shape == (B2, ffn_hidden_feats // 2)
    assert jnp.allclose(h2, h2_ref, atol=ATOL, rtol=RTOL)
    assert jnp.allclose(out2, out2_ref, atol=ATOL, rtol=RTOL)

    print("KERNEL_OK")
</pallas_src>

<mosaic_0001>
module attributes {stable_mosaic.version = 11 : i64} {
  func.func @base_gnn_kernel(%arg0: i32, %arg1: i32, %arg2: memref<8x16x32xbf16, #tpu.memory_space<vmem>>, %arg3: memref<32x128xf32, #tpu.memory_space<vmem>>, %arg4: memref<1x128xf32, #tpu.memory_space<vmem>>, %arg5: memref<128x128xf32, #tpu.memory_space<vmem>>, %arg6: memref<1x128xf32, #tpu.memory_space<vmem>>, %arg7: memref<128x128xf32, #tpu.memory_space<vmem>>, %arg8: memref<1x128xf32, #tpu.memory_space<vmem>>, %arg9: memref<8x128xf32, #tpu.memory_space<vmem>>, %arg10: memref<8x128xf32, #tpu.memory_space<vmem>>, %arg11: memref<8x32xf32, #tpu.memory_space<vmem>>) attributes {dimension_semantics = [#tpu.dimension_semantics<parallel>, #tpu.dimension_semantics<arbitrary>], iteration_bounds = array<i64: 1, 1>, scalar_prefetch = 0 : i64, scratch_operands = 1 : i64, tpu.core_type = #tpu.core_type<tc>, window_params = [{transform_indices = @transform_0, window_bounds = array<i64: 8, 16, 32>}, {pipeline_mode = #tpu.pipeline_mode<synchronous>, transform_indices = @transform_1, window_bounds = array<i64: 32, 128>}, {pipeline_mode = #tpu.pipeline_mode<synchronous>, transform_indices = @transform_2, window_bounds = array<i64: 1, 128>}, {pipeline_mode = #tpu.pipeline_mode<synchronous>, transform_indices = @transform_3, window_bounds = array<i64: 128, 128>}, {pipeline_mode = #tpu.pipeline_mode<synchronous>, transform_indices = @transform_4, window_bounds = array<i64: 1, 128>}, {pipeline_mode = #tpu.pipeline_mode<synchronous>, transform_indices = @transform_5, window_bounds = array<i64: 128, 128>}, {pipeline_mode = #tpu.pipeline_mode<synchronous>, transform_indices = @transform_6, window_bounds = array<i64: 1, 128>}, {transform_indices = @transform_7, window_bounds = array<i64: 8, 128>}, {transform_indices = @transform_8, window_bounds = array<i64: 8, 128>}]} {
    %c0_i32 = arith.constant 0 : i32
    %0 = arith.cmpi eq, %arg1, %c0_i32 : i32
    %1 = arith.extui %0 : i1 to i32
    %c0_i32_0 = arith.constant 0 : i32
    %2 = arith.cmpi ne, %1, %c0_i32_0 : i32
    scf.if %2 {
      %cst_9 = arith.constant 0.000000e+00 : f32
      %12 = vector.broadcast %cst_9 : f32 to vector<8x32xf32>
      %c0_10 = arith.constant 0 : index
      %c0_11 = arith.constant 0 : index
      %13 = vector.load %arg11[%c0_10, %c0_11] : memref<8x32xf32, #tpu.memory_space<vmem>>, vector<8x32xf32>
      tpu.vector_store %arg11[%c0_10, %c0_11], %12 {strides = array<i32>} : memref<8x32xf32, #tpu.memory_space<vmem>>, vector<8x32xf32>,
    } else {
    }
    %c0 = arith.constant 0 : index
    %c0_1 = arith.constant 0 : index
    %c0_2 = arith.constant 0 : index
    %3 = vector.load %arg2[%c0, %c0_1, %c0_2] : memref<8x16x32xbf16, #tpu.memory_space<vmem>>, vector<8x16x32xbf16>
    %4 = arith.extf %3 : vector<8x16x32xbf16> to vector<8x16x32xf32>
    %c0_3 = arith.constant 0 : index
    %c0_4 = arith.constant 0 : index
    %5 = vector.load %arg11[%c0_3, %c0_4] : memref<8x32xf32, #tpu.memory_space<vmem>>, vector<8x32xf32>
    %cst = arith.constant dense<0.000000e+00> : vector<8x32xf32>
    %6 = vector.multi_reduction <add>, %4, %cst [1] : vector<8x16x32xf32> to vector<8x32xf32>
    %7 = arith.addf %5, %6 : vector<8x32xf32>
    %c0_5 = arith.constant 0 : index
    %c0_6 = arith.constant 0 : index
    %8 = vector.load %arg11[%c0_5, %c0_6] : memref<8x32xf32, #tpu.memory_space<vmem>>, vector<8x32xf32>
    tpu.vector_store %arg11[%c0_5, %c0_6], %7 {strides = array<i32>} : memref<8x32xf32, #tpu.memory_space<vmem>>, vector<8x32xf32>,
    %c0_i32_7 = arith.constant 0 : i32
    %9 = arith.cmpi eq, %arg1, %c0_i32_7 : i32
    %10 = arith.extui %9 : i1 to i32
    %c0_i32_8 = arith.constant 0 : i32
    %11 = arith.cmpi ne, %10, %c0_i32_8 : i32
    scf.if %11 {
      %c0_9 = arith.constant 0 : index
      %c0_10 = arith.constant 0 : index
      %12 = vector.load %arg11[%c0_9, %c0_10] : memref<8x32xf32, #tpu.memory_space<vmem>>, vector<8x32xf32>
      %cst_11 = arith.constant 6.250000e-02 : f32
      %13 = vector.broadcast %cst_11 : f32 to vector<8x32xf32>
      %14 = arith.mulf %12, %13 : vector<8x32xf32>
      %c0_12 = arith.constant 0 : index
      %c0_13 = arith.constant 0 : index
      %15 = vector.load %arg3[%c0_12, %c0_13] : memref<32x128xf32, #tpu.memory_space<vmem>>, vector<32x128xf32>
      %cst_14 = arith.constant dense<0.000000e+00> : vector<8x128xf32>
      %16 = tpu.matmul %14, %15, %cst_14 {dimension_numbers = #tpu.dot_dimension_numbers<[1], [0], [0], [1], [0, 0, 1, 1], [], []>} : vector<8x32xf32>, vector<32x128xf32>, vector<8x128xf32> -> vector<8x128xf32>
      %c0_15 = arith.constant 0 : index
      %c0_16 = arith.constant 0 : index
      %17 = vector.load %arg4[%c0_15, %c0_16] : memref<1x128xf32, #tpu.memory_space<vmem>>, vector<1x128xf32>
      %18 = vector.broadcast %17 : vector<1x128xf32> to vector<8x128xf32>
      %19 = arith.addf %16, %18 : vector<8x128xf32>
      %c0_17 = arith.constant 0 : index
      %c0_18 = arith.constant 0 : index
      %20 = vector.load %arg5[%c0_17, %c0_18] : memref<128x128xf32, #tpu.memory_space<vmem>>, vector<128x128xf32>
      %cst_19 = arith.constant dense<0.000000e+00> : vector<8x128xf32>
      %21 = tpu.matmul %19, %20, %cst_19 {dimension_numbers = #tpu.dot_dimension_numbers<[1], [0], [0], [1], [0, 0, 1, 1], [], []>} : vector<8x128xf32>, vector<128x128xf32>, vector<8x128xf32> -> vector<8x128xf32>
      %c0_20 = arith.constant 0 : index
      %c0_21 = arith.constant 0 : index
      %22 = vector.load %arg6[%c0_20, %c0_21] : memref<1x128xf32, #tpu.memory_space<vmem>>, vector<1x128xf32>
      %23 = vector.broadcast %22 : vector<1x128xf32> to vector<8x128xf32>
      %24 = arith.addf %21, %23 : vector<8x128xf32>
      %cst_22 = arith.constant 0.000000e+00 : f32
      %25 = vector.broadcast %cst_22 : f32 to vector<8x128xf32>
      %26 = arith.maximumf %24, %25 : vector<8x128xf32>
      %c0_23 = arith.constant 0 : index
      %c0_24 = arith.constant 0 : index
      %27 = vector.load %arg7[%c0_23, %c0_24] : memref<128x128xf32, #tpu.memory_space<vmem>>, vector<128x128xf32>
      %cst_25 = arith.constant dense<0.000000e+00> : vector<8x128xf32>
      %28 = tpu.matmul %26, %27, %cst_25 {dimension_numbers = #tpu.dot_dimension_numbers<[1], [0], [0], [1], [0, 0, 1, 1], [], []>} : vector<8x128xf32>, vector<128x128xf32>, vector<8x128xf32> -> vector<8x128xf32>
      %c0_26 = arith.constant 0 : index
      %c0_27 = arith.constant 0 : index
      %29 = vector.load %arg8[%c0_26, %c0_27] : memref<1x128xf32, #tpu.memory_space<vmem>>, vector<1x128xf32>
      %30 = vector.broadcast %29 : vector<1x128xf32> to vector<8x128xf32>
      %31 = arith.addf %28, %30 : vector<8x128xf32>
      %c0_28 = arith.constant 0 : index
      %c0_29 = arith.constant 0 : index
      %32 = vector.load %arg9[%c0_28, %c0_29] : memref<8x128xf32, #tpu.memory_space<vmem>>, vector<8x128xf32>
      tpu.vector_store %arg9[%c0_28, %c0_29], %19 {strides = array<i32>} : memref<8x128xf32, #tpu.memory_space<vmem>>, vector<8x128xf32>,
      %c0_30 = arith.constant 0 : index
      %c0_31 = arith.constant 0 : index
      %33 = vector.load %arg10[%c0_30, %c0_31] : memref<8x128xf32, #tpu.memory_space<vmem>>, vector<8x128xf32>
      tpu.vector_store %arg10[%c0_30, %c0_31], %31 {strides = array<i32>} : memref<8x128xf32, #tpu.memory_space<vmem>>, vector<8x128xf32>,
    } else {
    }
    return
  }
  func.func @transform_0(%arg0: i32, %arg1: i32) -> (i32, i32, i32) {
    %c0_i32 = arith.constant 0 : i32
    %c0_i32_0 = arith.constant 0 : i32
    return %arg0, %arg1, %c0_i32 : i32, i32, i32
  }
  func.func @transform_1(%arg0: i32, %arg1: i32) -> (i32, i32) {
    %c0_i32 = arith.constant 0 : i32
    %c0_i32_0 = arith.constant 0 : i32
    %c0_i32_1 = arith.constant 0 : i32
    return %c0_i32, %c0_i32_0 : i32, i32
  }
  func.func @transform_2(%arg0: i32, %arg1: i32) -> (i32, i32) {
    %c0_i32 = arith.constant 0 : i32
    %c0_i32_0 = arith.constant 0 : i32
    %c0_i32_1 = arith.constant 0 : i32
    return %c0_i32, %c0_i32_0 : i32, i32
  }
  func.func @transform_3(%arg0: i32, %arg1: i32) -> (i32, i32) {
    %c0_i32 = arith.constant 0 : i32
    %c0_i32_0 = arith.constant 0 : i32
    %c0_i32_1 = arith.constant 0 : i32
    return %c0_i32, %c0_i32_0 : i32, i32
  }
  func.func @transform_4(%arg0: i32, %arg1: i32) -> (i32, i32) {
    %c0_i32 = arith.constant 0 : i32
    %c0_i32_0 = arith.constant 0 : i32
    %c0_i32_1 = arith.constant 0 : i32
    return %c0_i32, %c0_i32_0 : i32, i32
  }
  func.func @transform_5(%arg0: i32, %arg1: i32) -> (i32, i32) {
    %c0_i32 = arith.constant 0 : i32
    %c0_i32_0 = arith.constant 0 : i32
    %c0_i32_1 = arith.constant 0 : i32
    return %c0_i32, %c0_i32_0 : i32, i32
  }
  func.func @transform_6(%arg0: i32, %arg1: i32) -> (i32, i32) {
    %c0_i32 = arith.constant 0 : i32
    %c0_i32_0 = arith.constant 0 : i32
    %c0_i32_1 = arith.constant 0 : i32
    return %c0_i32, %c0_i32_0 : i32, i32
  }
  func.func @transform_7(%arg0: i32, %arg1: i32) -> (i32, i32) {
    %c0_i32 = arith.constant 0 : i32
    %c0_i32_0 = arith.constant 0 : i32
    return %arg0, %c0_i32 : i32, i32
  }
  func.func @transform_8(%arg0: i32, %arg1: i32) -> (i32, i32) {
    %c0_i32 = arith.constant 0 : i32
    %c0_i32_0 = arith.constant 0 : i32
    return %arg0, %c0_i32 : i32, i32
  }
}

</mosaic_0001>

<bundles_post_ra>
// kernel: tpu_custom_call.1
= control target key start
LH: loop header
LB: loop body
LE: loop exit
PB: predicated region body
PF: predicated region fallthrough
CT: control target
= control target key end

     0   :  { %14 = vsyncpa [#allocation4], 0  ;;  %s1106_s0 = inlined_call_operand.hbm [shape: bf16[8,16,32], index: 0, kind: input, shape index: {}]   ;;  %s1107_s1 = inlined_call_operand.hbm [shape: f32[32,128], index: 1, kind: input, shape index: {}]   ;;  %s1108_s2 = inlined_call_operand.vmem [shape: f32[1,128], index: 2, kind: input, shape index: {}]   ;;  %s1109_s3 = inlined_call_operand.hbm [shape: f32[128,128], index: 3, kind: input, shape index: {}]   ;;  %s1110_s4 = inlined_call_operand.vmem [shape: f32[1,128], index: 4, kind: input, shape index: {}]   ;;  %s1111_s5 = inlined_call_operand.hbm [shape: f32[128,128], index: 5, kind: input, shape index: {}]   ;;  %s1112_s6 = inlined_call_operand.vmem [shape: f32[1,128], index: 6, kind: input, shape index: {}]   ;;  %s1113_s7 = inlined_call_operand.hbm [shape: f32[8,128], index: 7, kind: output, shape index: {0}]   ;;  %s1114_s8 = inlined_call_operand.hbm [shape: f32[8,128], index: 8, kind: output, shape index: {1}]  }
   0x1   :  { %15 = vsyncpa [#allocation7], 0 }
   0x2   :  { %16 = vsyncpa [#allocation10], 0 }
   0x3   :  { %17 = vsyncpa [#allocation5], 0 }
   0x4   :  { %18 = vsyncpa [#allocation13], 0  ;;  %s903_s27 = smov [#allocation6]   ;;  %s761_s9 = scalar_lea.hbm %s1107_s1, 512 }
   0x5   :  { %s36_s28 = sshll.u32 %s903_s27, 4  ;;  %p762_p0 = scmp.ne.s32.totalorder %s1107_s1, %s761_s9  ;;  %s37_s28 = int_to_ptr.vmem [resolvable:$true] %s36_s28 }
   0x6   :  { %p765_p1 = scmp.lt.u32.totalorder %s761_s9, %s1107_s1 }
   0x8   :  { %p767_p2 = pnand %p765_p1, %p762_p0 }
   0xa   :  { %770 = shalt.err (!%p767_p2)
}
   0xb   :  { %s771_s14 = scalar_lea.vmem %s37_s28, 512  ;;  %p776_p4 = scmp.lt.s32.totalorder %s37_s28, %s37_s28 }
   0xc   :  { %p772_p3 = scmp.ne.s32.totalorder %s37_s28, %s771_s14  ;;  %p777_p5 = scmp.lt.s32.totalorder %s771_s14, %s771_s14 }
   0xe   :  { %p778_p6 = por %p777_p5, %p776_p4 }
  0x10   :  { %p779_p7 = pnand %p778_p6, %p772_p3 }
  0x12   :  { %782 = shalt.err (!%p779_p7)
}
  0x13   :  { %s904_s15 = smov 128   ;;  %s905_s16 = smov 8  }
  0x14   :  { %42 = dma.hbm_to_vmem [thread:$0]  %s1107_s1, 512, %s37_s28, [#allocation7], %s904_s15, %s904_s15, %s905_s16  }
  0x15   :  { %s906_s19 = smov [#allocation3]   ;;  %s783_s23 = scalar_lea.hbm %s1106_s0, 1024 }
  0x16   :  { %s24_s20 = sshll.u32 %s906_s19, 4  ;;  %p784_p8 = scmp.ne.s32.totalorder %s1106_s0, %s783_s23  ;;  %s25_s20 = int_to_ptr.vmem [resolvable:$true] %s24_s20 }
  0x17   :  { %p787_p9 = scmp.lt.u32.totalorder %s783_s23, %s1106_s0 }
  0x19   :  { %p789_p10 = pnand %p787_p9, %p784_p8 }
  0x1b   :  { %792 = shalt.err (!%p789_p10)
}
  0x1c   :  { %s793_s29 = scalar_lea.vmem %s25_s20, 1024  ;;  %p798_p12 = scmp.lt.s32.totalorder %s25_s20, %s25_s20 }
  0x1d   :  { %p794_p11 = scmp.ne.s32.totalorder %s25_s20, %s793_s29  ;;  %p799_p13 = scmp.lt.s32.totalorder %s793_s29, %s793_s29 }
  0x1f   :  { %p800_p0 = por %p799_p13, %p798_p12 }
  0x21   :  { %p801_p1 = pnand %p800_p0, %p794_p11 }
  0x23   :  { %804 = shalt.err (!%p801_p1)
}
  0x24   :  { %s907_s1 = smov 64   ;;  %s908_s28 = smov 4  }
  0x25   :  { %30 = dma.hbm_to_vmem [thread:$0]  %s1106_s0, 1024, %s25_s20, [#allocation4], %s907_s1, %s907_s1, %s908_s28  }
  0x26   :  { %s909_s10 = smov [#allocation8]   ;;  %s910_s12 = smov [#allocation9]  }
  0x27   :  { %s50_s11 = sshll.u32 %s909_s10, 4  ;;  %s64_s13 = sshll.u32 %s910_s12, 4  ;;  %s51_s11 = int_to_ptr.vmem [resolvable:$true] %s50_s11  ;;  %s988_s13 = int_to_ptr.vmem [resolvable:$true] %s64_s13 }
  0x28   :  { %s805_s18 = scalar_lea.hbm %s1109_s3, 2048 }
  0x29   :  { %p806_p2 = scmp.ne.s32.totalorder %s1109_s3, %s805_s18  ;;  %p809_p3 = scmp.lt.u32.totalorder %s805_s18, %s1109_s3 }
  0x2b   :  { %p811_p4 = pnand %p809_p3, %p806_p2 }
  0x2d   :  { %814 = shalt.err (!%p811_p4)
}
  0x2e   :  { %s815_s0 = scalar_lea.vmem %s51_s11, 2048  ;;  %p820_p6 = scmp.lt.s32.totalorder %s51_s11, %s51_s11 }
  0x2f   :  { %p816_p5 = scmp.ne.s32.totalorder %s51_s11, %s815_s0  ;;  %p821_p7 = scmp.lt.s32.totalorder %s815_s0, %s815_s0 }
  0x31   :  { %p822_p8 = por %p821_p7, %p820_p6 }
  0x33   :  { %p823_p9 = pnand %p822_p8, %p816_p5 }
  0x35   :  { %826 = shalt.err (!%p823_p9)
}
  0x36   :  { %56 = dma.hbm_to_vmem [thread:$0]  %s1109_s3, 2048, %s51_s11, [#allocation7], %s904_s15, %s904_s15, %s905_s16  }
  0x37   :  { %s827_s27 = scalar_lea.hbm %s1111_s5, 2048 }
  0x38   :  { %p828_p10 = scmp.ne.s32.totalorder %s1111_s5, %s827_s27  ;;  %p831_p11 = scmp.lt.u32.totalorder %s827_s27, %s1111_s5 }
  0x3a   :  { %p833_p12 = pnand %p831_p11, %p828_p10 }
  0x3c   :  { %836 = shalt.err (!%p833_p12)
}
  0x3d   :  { %s837_s9 = scalar_lea.vmem %s988_s13, 2048  ;;  %p842_p0 = scmp.lt.s32.totalorder %s988_s13, %s988_s13 }
  0x3e   :  { %p838_p13 = scmp.ne.s32.totalorder %s988_s13, %s837_s9  ;;  %p843_p1 = scmp.lt.s32.totalorder %s837_s9, %s837_s9 }
  0x40   :  { %p844_p2 = por %p843_p1, %p842_p0 }
  0x42   :  { %p845_p3 = pnand %p844_p2, %p838_p13 }
  0x44   :  { %848 = shalt.err (!%p845_p3)
}
  0x45   :  { %70 = dma.hbm_to_vmem [thread:$0]  %s1111_s5, 2048, %s988_s13, [#allocation10], %s904_s15, %s904_s15, %s905_s16  }
  0x46   :  { %893 = dma.done.wait [#allocation4], 1024  }
  0x47   :  { %894 = vsyncadd [#allocation4], 4294966272 }
  0x48   :  { %895 = dma.done.wait [#allocation7], 2560  }
  0x49   :  { %896 = vsyncadd [#allocation7], 4294964736 }
  0x4a   :  { %897 = dma.done.wait [#allocation10], 2048  }
  0x4b   :  { %898 = vsyncadd [#allocation10], 4294965248  ;;  %vm89_vm0 = vcmask 261120   ;;  %v911_v0 = vmov 0.0|0.0   ;;  %v912_v1 = vmov 0.0   ;;  %vm913_vm1 = vmmov 0  }
  0x4c   :  { %694 = vmatprep.subr.bf16.mxu0 %v911_v0  ;;  %90 = vst.msk [vmem:[#allocation2] sm:$0xff] %vm89_vm0, %v912_v1  ;;  %700 = vmatprep.subr.bf16.mxu1 %v911_v0  ;;  %v227_v2 = vld [vmem:[#allocation6] sm:$0xff]  ;;  %v228_v3 = vld [vmem:[#allocation6 + $0x8] sm:$0xff]  ;;  %v229_v4 = vld [vmem:[#allocation6 + $0x10] sm:$0xff]  ;;  %vm205_vm2 = vcmask 1041409   ;;  %vm207_vm3 = vcmask 1042434  }
  0x4d   :  { %621 = vmatprep.mubr.msk.f32.mxu0 %vm913_vm1, %v912_v1  ;;  %656 = vmatprep.mubr.msk.f32.mxu1 %vm913_vm1, %v912_v1  ;;  %v695_v5 = vpack.c.bf16 %v228_v3, %v227_v2  ;;  %v230_v6 = vld [vmem:[#allocation6 + $0x18] sm:$0xff]  ;;  %v536_v7 = vld [vmem:[#allocation3] sm:$0xff]   ;;  %v567_v8 = vld [vmem:[#allocation3 + $0x8] sm:$0xff]   ;;  %vm209_vm4 = vcmask 1043459   ;;  %vm211_vm5 = vcmask 1044484   ;;  %vm213_vm6 = vcmask 1045509  }
  0x4e   :  { %v698_v9 = vpack.c.bf16 %v230_v6, %v229_v4  ;;  %v537_v10 = vunpack.c.l.bf16 %v536_v7  ;;  %v538_v11 = vunpack.c.h.bf16 %v536_v7  ;;  %v541_v12 = vunpack.c.l.bf16 %v567_v8  ;;  %v568_v13 = vld [vmem:[#allocation3 + $0x10] sm:$0xff]   ;;  %v569_v14 = vld [vmem:[#allocation3 + $0x18] sm:$0xff]   ;;  %v570_v15 = vld [vmem:[#allocation3 + $0x20] sm:$0xff]   ;;  %s914_s12 = smov [#allocation11]  }
  0x4f   :  { %696 = vmatpush3.bf16.msra.mxu0 %v695_v5  ;;  %v542_v16 = vunpack.c.h.bf16 %v567_v8  ;;  %v545_v17 = vunpack.c.l.bf16 %v568_v13  ;;  %v546_v18 = vunpack.c.h.bf16 %v568_v13  ;;  %v549_v19 = vunpack.c.l.bf16 %v569_v14  ;;  %v571_v20 = vld [vmem:[#allocation3 + $0x28] sm:$0xff]   ;;  %v572_v21 = vld [vmem:[#allocation3 + $0x30] sm:$0xff]   ;;  %v573_v22 = vld [vmem:[#allocation3 + $0x38] sm:$0xff]  }
  0x50   :  { %697 = vmatprep.subr.bf16.mxu0 %v911_v0  ;;  %v550_v23 = vunpack.c.h.bf16 %v569_v14  ;;  %v553_v24 = vunpack.c.l.bf16 %v570_v15  ;;  %v554_v25 = vunpack.c.h.bf16 %v570_v15  ;;  %v557_v26 = vunpack.c.l.bf16 %v571_v20 }
  0x51   :  { %v558_v27 = vunpack.c.h.bf16 %v571_v20  ;;  %v561_v28 = vunpack.c.l.bf16 %v572_v21  ;;  %v562_v29 = vunpack.c.h.bf16 %v572_v21  ;;  %v565_v30 = vunpack.c.l.bf16 %v573_v22  ;;  %v311_v21 = vld [vmem:[#allocation8] sm:$0xff] }
  0x52   :  { %v566_v31 = vunpack.c.h.bf16 %v573_v22  ;;  %v125_v32 = vsel %vm89_vm0, %v537_v10, 0.0  ;;  %v126_v33 = vsel %vm89_vm0, %v538_v11, 0.0  ;;  %v134_v34 = vsel %vm89_vm0, %v541_v12, 0.0  ;;  %v312_v22 = vld [vmem:[#allocation8 + $0x8] sm:$0xff] }
  0x53   :  { %699 = vmatpush3.bf16.msra.mxu0 %v698_v9  ;;  %v127_v35 = vadd.f32 %v126_v33, %v125_v32  ;;  %v135_v36 = vsel %vm89_vm0, %v542_v16, 0.0  ;;  %v143_v37 = vsel %vm89_vm0, %v545_v17, 0.0  ;;  %v144_v38 = vsel %vm89_vm0, %v546_v18, 0.0  ;;  %v314_v32 = vld [vmem:[#allocation8 + $0x18] sm:$0xff] }
  0x54   :  { %v136_v39 = vadd.f32 %v135_v36, %v134_v34  ;;  %v145_v40 = vadd.f32 %v144_v38, %v143_v37  ;;  %v152_v41 = vsel %vm89_vm0, %v549_v19, 0.0  ;;  %v153_v42 = vsel %vm89_vm0, %v550_v23, 0.0  ;;  %724 = vmatprep.subr.bf16.mxu0 %v911_v0 }
  0x55   :  { %v128_v43 = vrot.slane %v127_v35, 4  ;;  %v154_v44 = vadd.f32 %v153_v42, %v152_v41  ;;  %v161_v45 = vsel %vm89_vm0, %v553_v24, 0.0  ;;  %v162_v46 = vsel %vm89_vm0, %v554_v25, 0.0 }
  0x56   :  { %v137_v47 = vrot.slane %v136_v39, 4  ;;  %v146_v48 = vrot.slane %v145_v40, 4  ;;  %v163_v49 = vadd.f32 %v162_v46, %v161_v45  ;;  %v170_v50 = vsel %vm89_vm0, %v557_v26, 0.0  ;;  %v315_v46 = vld [vmem:[#allocation8 + $0x20] sm:$0xff] }
  0x57   :  { %v129_v51 = vadd.f32 %v128_v43, %v127_v35  ;;  %v155_v52 = vrot.slane %v154_v44, 4  ;;  %v171_v53 = vsel %vm89_vm0, %v558_v27, 0.0  ;;  %v179_v54 = vsel %vm89_vm0, %v561_v28, 0.0 }
  0x58   :  { %v138_v55 = vadd.f32 %v137_v47, %v136_v39  ;;  %v147_v56 = vadd.f32 %v146_v48, %v145_v40  ;;  %v164_v57 = vrot.slane %v163_v49, 4  ;;  %v172_v58 = vadd.f32 %v171_v53, %v170_v50  ;;  %v316_v47 = vld [vmem:[#allocation8 + $0x28] sm:$0xff] }
  0x59   :  { %v130_v59 = vrot.slane %v129_v51, 2  ;;  %v156_v60 = vadd.f32 %v155_v52, %v154_v44  ;;  %v180_v61 = vsel %vm89_vm0, %v562_v29, 0.0  ;;  %v188_v62 = vsel %vm89_vm0, %v565_v30, 0.0 }
  0x5a   :  { %v139_v63 = vrot.slane %v138_v55, 2  ;;  %v148_v2 = vrot.slane %v147_v56, 2  ;;  %v165_v3 = vadd.f32 %v164_v57, %v163_v49  ;;  %v173_v4 = vrot.slane %v172_v58, 4  ;;  %v123_v57 = vld [vmem:[#allocation2] sm:$0xff] }
  0x5b   :  { %v131_v5 = vadd.f32 %v130_v59, %v129_v51  ;;  %v157_v6 = vrot.slane %v156_v60, 2  ;;  %v181_v7 = vadd.f32 %v180_v61, %v179_v54  ;;  %v189_v8 = vsel %vm89_vm0, %v566_v31, 0.0  ;;  %v313_v31 = vld [vmem:[#allocation8 + $0x10] sm:$0xff] }
  0x5c   :  { %v140_v9 = vadd.f32 %v139_v63, %v138_v55  ;;  %v149_v10 = vadd.f32 %v148_v2, %v147_v56  ;;  %v166_v11 = vrot.slane %v165_v3, 2  ;;  %v174_v12 = vadd.f32 %v173_v4, %v172_v58  ;;  %v317_v55 = vld [vmem:[#allocation8 + $0x30] sm:$0xff]  ;;  %v318_v56 = vld [vmem:[#allocation8 + $0x38] sm:$0xff]  ;;  %v319_v63 = vld [vmem:[#allocation8 + $0x40] sm:$0xff] }
  0x5d   :  { %v132_v13 = vrot.slane %v131_v5, 1  ;;  %v158_v14 = vadd.f32 %v157_v6, %v156_v60  ;;  %v182_v15 = vrot.slane %v181_v7, 4  ;;  %v190_v16 = vadd.f32 %v189_v8, %v188_v62  ;;  %v320_v2 = vld [vmem:[#allocation8 + $0x48] sm:$0xff]  ;;  %v321_v4 = vld [vmem:[#allocation8 + $0x50] sm:$0xff] }
  0x5e   :  { %v141_v17 = vrot.slane %v140_v9, 1  ;;  %v150_v18 = vrot.slane %v149_v10, 1  ;;  %v167_v19 = vadd.f32 %v166_v11, %v165_v3  ;;  %v175_v20 = vrot.slane %v174_v12, 2  ;;  %v324_v8 = vld [vmem:[#allocation8 + $0x68] sm:$0xff] }
  0x5f   :  { %v133_v23 = vadd.f32 %v132_v13, %v131_v5  ;;  %v159_v24 = vrot.slane %v158_v14, 1  ;;  %v183_v25 = vadd.f32 %v182_v15, %v181_v7  ;;  %v191_v26 = vrot.slane %v190_v16, 4  ;;  %v322_v5 = vld [vmem:[#allocation8 + $0x58] sm:$0xff]  ;;  %v323_v7 = vld [vmem:[#allocation8 + $0x60] sm:$0xff] }
  0x60   :  { %v142_v27 = vadd.f32 %v141_v17, %v140_v9  ;;  %v151_v28 = vadd.f32 %v150_v18, %v149_v10  ;;  %v168_v29 = vrot.slane %v167_v19, 1  ;;  %v176_v30 = vadd.f32 %v175_v20, %v174_v12  ;;  %v325_v12 = vld [vmem:[#allocation8 + $0x70] sm:$0xff]  ;;  %v326_v13 = vld [vmem:[#allocation8 + $0x78] sm:$0xff]  ;;  %v405_v15 = vld [vmem:[#allocation9] sm:$0xff] }
  0x61   :  { %v160_v33 = vadd.f32 %v159_v24, %v158_v14  ;;  %v184_v34 = vrot.slane %v183_v25, 2  ;;  %v192_v35 = vadd.f32 %v191_v26, %v190_v16  ;;  %v701_v36 = vpack.c.bf16 %v312_v22, %v311_v21  ;;  %v406_v16 = vld [vmem:[#allocation9 + $0x8] sm:$0xff]  ;;  %v407_v17 = vld [vmem:[#allocation9 + $0x10] sm:$0xff]  ;;  %v409_v21 = vld [vmem:[#allocation9 + $0x20] sm:$0xff] }
  0x62   :  { %v169_v37 = vadd.f32 %v168_v29, %v167_v19  ;;  %v177_v38 = vrot.slane %v176_v30, 1  ;;  %v206_v39 = vsel %vm205_vm2, %v142_v27, %v133_v23  ;;  %v704_v43 = vpack.c.bf16 %v314_v32, %v313_v31  ;;  %v408_v19 = vld [vmem:[#allocation9 + $0x18] sm:$0xff]  ;;  %v410_v22 = vld [vmem:[#allocation9 + $0x28] sm:$0xff]  ;;  %v411_v23 = vld [vmem:[#allocation9 + $0x30] sm:$0xff] }
  0x63   :  { %v185_v40 = vadd.f32 %v184_v34, %v183_v25  ;;  %v193_v41 = vrot.slane %v192_v35, 2  ;;  %v208_v42 = vsel %vm207_vm3, %v151_v28, %v206_v39  ;;  %702 = vmatpush3.bf16.msra.mxu1 %v701_v36  ;;  %vm215_vm7 = vcmask 1046534   ;;  %v412_v24 = vld [vmem:[#allocation9 + $0x38] sm:$0xff]  ;;  %v413_v26 = vld [vmem:[#allocation9 + $0x40] sm:$0xff]  ;;  %v414_v27 = vld [vmem:[#allocation9 + $0x48] sm:$0xff] }
  0x64   :  { %v178_v44 = vadd.f32 %v177_v38, %v176_v30  ;;  %v210_v45 = vsel %vm209_vm4, %v160_v33, %v208_v42  ;;  %703 = vmatprep.subr.bf16.mxu1 %v911_v0  ;;  %v707_v54 = vpack.c.bf16 %v316_v47, %v315_v46  ;;  %vm217_vm8 = vcmask 1047559   ;;  %v415_v29 = vld [vmem:[#allocation9 + $0x50] sm:$0xff]  ;;  %v416_v30 = vld [vmem:[#allocation9 + $0x58] sm:$0xff]  ;;  %v417_v32 = vld [vmem:[#allocation9 + $0x60] sm:$0xff] }
  0x65   :  { %v186_v48 = vrot.slane %v185_v40, 1  ;;  %v194_v49 = vadd.f32 %v193_v41, %v192_v35  ;;  %v212_v50 = vsel %vm211_vm5, %v169_v37, %v210_v45  ;;  %v710_v61 = vpack.c.bf16 %v318_v56, %v317_v55  ;;  %v418_v33 = vld [vmem:[#allocation9 + $0x68] sm:$0xff]  ;;  %v531_v35 = vld [vmem:[%s1108_s2] ss:$0 sm:$0xff]  ;;  %v419_v39 = vld [vmem:[#allocation9 + $0x70] sm:$0xff]  ;;  %s506_s2 = sshll.u32 %s914_s12, 4  ;;  %s507_s2 = int_to_ptr.vmem [resolvable:$true] %s506_s2 }
  0x66   :  { %v214_v51 = vsel %vm213_vm6, %v178_v44, %v212_v50  ;;  %v713_v3 = vpack.c.bf16 %v320_v2, %v319_v63  ;;  %v716_v6 = vpack.c.bf16 %v322_v5, %v321_v4  ;;  %v719_v11 = vpack.c.bf16 %v324_v8, %v323_v7  ;;  %v533_v42 = vld [vmem:[%s1110_s4] ss:$0 sm:$0xff]  ;;  %s849_s13 = scalar_lea.vmem %s507_s2, 128  ;;  %p854_p5 = scmp.lt.s32.totalorder %s507_s2, %s507_s2 }
  0x67   :  { %v187_v52 = vadd.f32 %v186_v48, %v185_v40  ;;  %v195_v53 = vrot.slane %v194_v49, 1  ;;  %705 = vmatpush3.bf16.msra.mxu1 %v704_v43  ;;  %v722_v14 = vpack.c.bf16 %v326_v13, %v325_v12  ;;  %v725_v18 = vpack.c.bf16 %v406_v16, %v405_v15  ;;  %v420_v40 = vld [vmem:[#allocation9 + $0x78] sm:$0xff]  ;;  %p850_p4 = scmp.ne.s32.totalorder %s507_s2, %s849_s13  ;;  %p855_p6 = scmp.lt.s32.totalorder %s849_s13, %s849_s13 }
  0x68   :  { %706 = vmatprep.subr.bf16.mxu1 %v911_v0  ;;  %v728_v20 = vpack.c.bf16 %v408_v19, %v407_v17  ;;  %v734_v25 = vpack.c.bf16 %v412_v24, %v411_v23  ;;  %v737_v28 = vpack.c.bf16 %v414_v27, %v413_v26  ;;  %v740_v31 = vpack.c.bf16 %v416_v30, %v415_v29 }
  0x69   :  { %v196_v58 = vadd.f32 %v195_v53, %v194_v49  ;;  %v216_v59 = vsel %vm215_vm7, %v187_v52, %v214_v51  ;;  %v743_v34 = vpack.c.bf16 %v418_v33, %v417_v32  ;;  %v746_v41 = vpack.c.bf16 %v420_v40, %v419_v39  ;;  %p856_p7 = por %p855_p6, %p854_p5 }
  0x6b   :  { %v218_v60 = vsel %vm217_vm8, %v196_v58, %v216_v59  ;;  %708 = vmatpush3.bf16.msra.mxu1 %v707_v54  ;;  %p857_p8 = pnand %p856_p7, %p850_p4 }
  0x6c   :  { %v220_v62 = vadd.f32 %v218_v60, %v123_v57  ;;  %709 = vmatprep.subr.bf16.mxu1 %v911_v0 }
  0x6e   :  { %221 = vst.msk [vmem:[#allocation2] sm:$0xff] %vm89_vm0, %v220_v62 }
  0x6f   :  { %711 = vmatpush3.bf16.msra.mxu1 %v710_v61 }
  0x70   :  { %712 = vmatprep.subr.bf16.mxu1 %v911_v0 }
  0x73   :  { %714 = vmatpush3.bf16.msra.mxu1 %v713_v3 }
  0x74   :  { %715 = vmatprep.subr.bf16.mxu1 %v911_v0 }
  0x75   :  { %v225_v9 = vld [vmem:[#allocation2] sm:$0xff] }
  0x76   :  { %v226_v10 = vmul.f32 0.0625, %v225_v9 }
  0x77   :  { %717 = vmatpush3.bf16.msra.mxu1 %v716_v6 }
  0x78   :  { %622 = vmatmul.mubr.msk.f32.vlgmr.msra.gmra.mrb[0].mxu0 %vm89_vm0, %v226_v10  ;;  %718 = vmatprep.subr.bf16.mxu1 %v911_v0 }
  0x79   :  { %691 = vmatprep.mubr.msk.f32.mxu0 %vm913_vm1, %v912_v1  ;;  %726 = vmatpush3.bf16.msra.mxu0 %v725_v18  ;;  %v731_v1 = vpack.c.bf16 %v410_v22, %v409_v21 }
  0x7a   :  { %727 = vmatprep.subr.bf16.mxu0 %v911_v0 }
  0x7b   :  { %720 = vmatpush3.bf16.msra.mxu1 %v719_v11 }
  0x7c   :  { %721 = vmatprep.subr.bf16.mxu1 %v911_v0 }
  0x7d   :  { %729 = vmatpush3.bf16.msra.mxu0 %v728_v20 }
  0x7e   :  { %730 = vmatprep.subr.bf16.mxu0 %v911_v0 }
  0x7f   :  { %723 = vmatpush3.bf16.msra.mxu1 %v722_v14 }
  0x81   :  { %732 = vmatpush3.bf16.msra.mxu0 %v731_v1 }
  0x82   :  { %733 = vmatprep.subr.bf16.mxu0 %v911_v0 }
  0x85   :  { %735 = vmatpush3.bf16.msra.mxu0 %v734_v25 }
  0x86   :  { %736 = vmatprep.subr.bf16.mxu0 %v911_v0 }
  0x89   :  { %738 = vmatpush3.bf16.msra.mxu0 %v737_v28 }
  0x8a   :  { %739 = vmatprep.subr.bf16.mxu0 %v911_v0 }
  0x8d   :  { %741 = vmatpush3.bf16.msra.mxu0 %v740_v31 }
  0x8e   :  { %742 = vmatprep.subr.bf16.mxu0 %v911_v0 }
  0x91   :  { %744 = vmatpush3.bf16.msra.mxu0 %v743_v34 }
  0x92   :  { %745 = vmatprep.subr.bf16.mxu0 %v911_v0 }
  0x95   :  { %747 = vmatpush3.bf16.msra.mxu0 %v746_v41 }
 0x14b   :  { %v307_v36 = vpop.f32.mrb[0].mxu0 }
 0x14c   :  { %v308_v37 = vadd.f32 %v531_v35, %v307_v36  ;;  %v623_v38 = vpop.f32.mrb[1].mxu0 }
 0x14e   :  { %498 = vst [vmem:[#allocation11] sm:$0xff] %v308_v37  ;;  %657 = vmatmul.mubr.f32.vlgmr.msra.gmra.mrb[0].mxu1 %v308_v37 }
 0x221   :  { %v400_v43 = vpop.f32.mrb[0].mxu1 }
 0x222   :  { %v401_v44 = vadd.f32 %v533_v42, %v400_v43  ;;  %v658_v0 = vpop.f32.mrb[1].mxu1 }
 0x224   :  { %v404_v45 = vmax.f32 %v401_v44, 0.0 }
 0x226   :  { %692 = vmatmul.mubr.f32.vlgmr.msra.gmra.mrb[2].mxu0 %v404_v45 }
 0x227   :  { %860 = shalt.err (!%p857_p8)
}
 0x228   :  { %s861_s18 = scalar_lea.hbm %s1113_s7, 128 }
 0x229   :  { %p862_p9 = scmp.ne.s32.totalorder %s1113_s7, %s861_s18  ;;  %p865_p10 = scmp.lt.u32.totalorder %s861_s18, %s1113_s7 }
 0x22b   :  { %p867_p11 = pnand %p865_p10, %p862_p9 }
 0x22d   :  { %870 = shalt.err (!%p867_p11)
}
 0x22e   :  { %509 = dma.vmem_to_hbm [thread:$0]  %s507_s2, 128, %s1113_s7, [#allocation5]   ;;  %v534_v46 = vld [vmem:[%s1112_s6] ss:$0 sm:$0xff] }
 0x22f   :  { %s915_s25 = smov [#allocation12]  }
 0x230   :  { %s516_s26 = sshll.u32 %s915_s25, 4  ;;  %s517_s26 = int_to_ptr.vmem [resolvable:$true] %s516_s26 }
 0x231   :  { %s871_s27 = scalar_lea.vmem %s517_s26, 128  ;;  %p876_p13 = scmp.lt.s32.totalorder %s517_s26, %s517_s26 }
 0x232   :  { %p872_p12 = scmp.ne.s32.totalorder %s517_s26, %s871_s27  ;;  %p877_p0 = scmp.lt.s32.totalorder %s871_s27, %s871_s27 }
 0x234   :  { %p878_p1 = por %p877_p0, %p876_p13 }
 0x236   :  { %p879_p2 = pnand %p878_p1, %p872_p12 }
 0x2f9   :  { %v494_v47 = vpop.f32.mrb[2].mxu0 }
 0x2fa   :  { %v495_v48 = vadd.f32 %v534_v46, %v494_v47  ;;  %v693_v49 = vpop.f32.mrb[3].mxu0 }
 0x2fc   :  { %499 = vst [vmem:[#allocation12] sm:$0xff] %v495_v48 }
 0x2fd   :  { %882 = shalt.err (!%p879_p2)
}
 0x2fe   :  { %s883_s1 = scalar_lea.hbm %s1114_s8, 128 }
 0x2ff   :  { %p884_p3 = scmp.ne.s32.totalorder %s1114_s8, %s883_s1  ;;  %p887_p4 = scmp.lt.u32.totalorder %s883_s1, %s1114_s8 }
 0x301   :  { %p889_p5 = pnand %p887_p4, %p884_p3 }
 0x303   :  { %892 = shalt.err (!%p889_p5)
}
 0x304   :  { %519 = dma.vmem_to_hbm [thread:$0]  %s517_s26, 128, %s1114_s8, [#allocation13]  }
 0x305   :  { %899 = dma.done.wait [#allocation5], 128  }
 0x306   :  { %900 = vsyncadd [#allocation5], 4294967168 }
 0x307   :  { %901 = dma.done.wait [#allocation13], 128  }
 0x308   :  { %902 = vsyncadd [#allocation13], 4294967168 }
 0x309   :  { %526 = vsyncpa [#allocation4], 1 }
 0x30a   :  { %527 = vsyncpa [#allocation7], 1 }
 0x30b   :  { %528 = vsyncpa [#allocation10], 1 }
 0x30c   :  { %529 = vsyncpa [#allocation5], 1 }
 0x30d   :  { %530 = vsyncpa [#allocation13], 1 }

</bundles_post_ra>
